<compile_context>
chip_gen: v7x
topology: tpu7x:2x2x1
jax: 0.10.0
libtpu: 0.0.40
codegen_flags: <defaults>
</compile_context>

<pallas_src>
import functools

import jax
import jax.numpy as jnp
from jax.experimental import pallas as pl
from jax.experimental.pallas import tpu as pltpu


def _round_up(x, m):
    return (x + m - 1) // m * m


# ----------------------------- Pallas kernel -------------------------------
def _policy_kernel(x_ref, w1_ref, b1_ref, w2_ref, b2_ref, mu_ref):
    # x_ref : (F, TB)   state tile, batch on the lane axis
    # w1_ref: (H, F)    first linear weight, (out, in) layout
    # b1_ref: (H, 1)
    # w2_ref: (H, 1)    output-head weight as a column
    # b2_ref: (1, 1)
    # mu_ref: (1, TB)   lane-dense output row
    h = jnp.tanh(
        jnp.dot(w1_ref[...], x_ref[...], preferred_element_type=jnp.float32)
        + b1_ref[...]
    )  # (H, TB)
    # N=1 head: VPU multiply + cross-sublane sum (XLU) -- avoids a 2nd matmul.
    mu = jnp.sum(h * w2_ref[...], axis=0, keepdims=True) + b2_ref[...]  # (1, TB)
    mu_ref[...] = mu.astype(mu_ref.dtype)


# ------------------------------- wrapper ------------------------------------
@functools.partial(jax.jit, static_argnames=("max_batch_tile",))
def policy_forward(state, params, *, max_batch_tile=512):
    """state: (B, state_size) f32. Returns (mu (B, 1), sigma (action_dim,))."""
    w1, b1, w2, b2, log_std = params          # w1: (F, H), w2: (H, 1)
    B, F = state.shape
    H = w1.shape[1]

    # Batch tile: multiple of 128 (lane width), capped so the double-buffered
    # working set stays small even on v7x.
    TB = min(max_batch_tile, _round_up(B, 128))
    B_pad = _round_up(B, TB)
    n_tiles = B_pad // TB

    # Transposed, lane-dense layouts (done once in XLA; cheap / fusable).
    x_t = jnp.pad(state, ((0, B_pad - B), (0, 0))).T          # (F, B_pad)
    w1_t = w1.T                                               # (H, F)
    b1_c = b1.reshape(H, 1)
    w2_c = w2.reshape(H, 1)
    b2_s = b2.reshape(1, 1)

    cost = pl.CostEstimate(
        flops=2 * B * F * H + 3 * B * H,       # matmul + head mul/add + biases
        transcendentals=B * H,                 # tanh
        bytes_accessed=4 * (B * F + F * H + 2 * H + 1 + B),
    )

    mu_row = pl.pallas_call(
        _policy_kernel,
        out_shape=jax.ShapeDtypeStruct((1, B_pad), jnp.float32),
        grid=(n_tiles,),
        in_specs=[
            pl.BlockSpec((F, TB), lambda i: (0, i)),    # state tile (batch-tiled)
            pl.BlockSpec((H, F), lambda i: (0, 0)),     # weights stay resident
            pl.BlockSpec((H, 1), lambda i: (0, 0)),
            pl.BlockSpec((H, 1), lambda i: (0, 0)),
            pl.BlockSpec((1, 1), lambda i: (0, 0)),
        ],
        out_specs=pl.BlockSpec((1, TB), lambda i: (0, i)),
        compiler_params=pltpu.CompilerParams(
            dimension_semantics=("parallel",),
        ),
        cost_estimate=cost,
    )(x_t, w1_t, b1_c, w2_c, b2_s)

    mu = mu_row[0, :B].reshape(B, 1)
    # sigma is state-independent: compute it once in the wrapper, not per tile.
    sigma = jnp.exp(log_std)
    return mu, sigma


# ----------------------------- parameter init ------------------------------
def init_params(key, state_size, hidden_nodes, action_dim):
    """Deterministic init mirroring nn.Linear defaults (U[-1/sqrt(fan_in), ...])."""
    k1, k2, k3, k4 = jax.random.split(key, 4)
    lim1 = 1.0 / jnp.sqrt(state_size)
    lim2 = 1.0 / jnp.sqrt(hidden_nodes)
    w1 = jax.random.uniform(k1, (state_size, hidden_nodes), jnp.float32, -lim1, lim1)
    b1 = jax.random.uniform(k2, (hidden_nodes,), jnp.float32, -lim1, lim1)
    w2 = jax.random.uniform(k3, (hidden_nodes, 1), jnp.float32, -lim2, lim2)
    b2 = jax.random.uniform(k4, (1,), jnp.float32, -lim2, lim2)
    log_std = -0.5 * jnp.ones((action_dim,), jnp.float32)  # matches PyTorch init
    return (w1, b1, w2, b2, log_std)


def _reference(state, params):
    w1, b1, w2, b2, log_std = params
    mu = jnp.tanh(state @ w1 + b1) @ w2 + b2
    return mu, jnp.exp(log_std)


# --------------------------------- main -------------------------------------
if __name__ == "__main__":
    # Small shapes consistent with the module: batch=8, state_size=8,
    # hidden_nodes=32, action_dim=1 (mu head outputs a single action mean).
    B, STATE, HIDDEN, ACT = 8, 8, 32, 1

    key = jax.random.PRNGKey(0)
    kx, kp, kx2 = jax.random.split(key, 3)
    state = jax.random.normal(kx, (B, STATE), jnp.float32)
    params = init_params(kp, STATE, HIDDEN, ACT)

    mu, sigma = policy_forward(state, params)
    jax.block_until_ready((mu, sigma))

    mu_ref, sigma_ref = _reference(state, params)
    assert mu.shape == (B, 1) and sigma.shape == (ACT,)
    assert jnp.allclose(mu, mu_ref, atol=1e-5, rtol=1e-5)
    assert jnp.allclose(sigma, sigma_ref, atol=1e-6, rtol=1e-6)

    # Exercise the batched / multi-tile grid path (rollout-sized batch,
    # padding + grid=3, weights resident across grid steps).
    B2 = 300
    state2 = jax.random.normal(kx2, (B2, STATE), jnp.float32)
    mu2, sigma2 = policy_forward(state2, params, max_batch_tile=128)
    jax.block_until_ready((mu2, sigma2))
    mu2_ref, _ = _reference(state2, params)
    assert mu2.shape == (B2, 1)
    assert jnp.allclose(mu2, mu2_ref, atol=1e-5, rtol=1e-5)

    print("KERNEL_OK")
</pallas_src>

<mosaic_0001>
module attributes {stable_mosaic.version = 11 : i64} {
  func.func @_policy_kernel(%arg0: i32, %arg1: memref<8x128xf32, #tpu.memory_space<vmem>>, %arg2: memref<32x8xf32, #tpu.memory_space<vmem>>, %arg3: memref<32x1xf32, #tpu.memory_space<vmem>>, %arg4: memref<32x1xf32, #tpu.memory_space<vmem>>, %arg5: memref<1x1xf32, #tpu.memory_space<vmem>>, %arg6: memref<1x128xf32, #tpu.memory_space<vmem>>) attributes {dimension_semantics = [#tpu.dimension_semantics<parallel>], iteration_bounds = array<i64: 1>, scalar_prefetch = 0 : i64, scratch_operands = 0 : i64, tpu.core_type = #tpu.core_type<tc>, window_params = [{transform_indices = @transform_0, window_bounds = array<i64: 8, 128>}, {pipeline_mode = #tpu.pipeline_mode<synchronous>, transform_indices = @transform_1, window_bounds = array<i64: 32, 8>}, {pipeline_mode = #tpu.pipeline_mode<synchronous>, transform_indices = @transform_2, window_bounds = array<i64: 32, 1>}, {pipeline_mode = #tpu.pipeline_mode<synchronous>, transform_indices = @transform_3, window_bounds = array<i64: 32, 1>}, {pipeline_mode = #tpu.pipeline_mode<synchronous>, transform_indices = @transform_4, window_bounds = array<i64: 1, 1>}, {transform_indices = @transform_5, window_bounds = array<i64: 1, 128>}]} {
    %c0 = arith.constant 0 : index
    %c0_0 = arith.constant 0 : index
    %0 = vector.load %arg2[%c0, %c0_0] : memref<32x8xf32, #tpu.memory_space<vmem>>, vector<32x8xf32>
    %c0_1 = arith.constant 0 : index
    %c0_2 = arith.constant 0 : index
    %1 = vector.load %arg1[%c0_1, %c0_2] : memref<8x128xf32, #tpu.memory_space<vmem>>, vector<8x128xf32>
    %cst = arith.constant dense<0.000000e+00> : vector<32x128xf32>
    %2 = tpu.matmul %0, %1, %cst {dimension_numbers = #tpu.dot_dimension_numbers<[1], [0], [0], [1], [0, 0, 1, 1], [], []>} : vector<32x8xf32>, vector<8x128xf32>, vector<32x128xf32> -> vector<32x128xf32>
    %c0_3 = arith.constant 0 : index
    %c0_4 = arith.constant 0 : index
    %3 = vector.load %arg3[%c0_3, %c0_4] : memref<32x1xf32, #tpu.memory_space<vmem>>, vector<32x1xf32>
    %4 = vector.broadcast %3 : vector<32x1xf32> to vector<32x128xf32>
    %5 = arith.addf %2, %4 : vector<32x128xf32>
    %6 = math.tanh %5 : vector<32x128xf32>
    %c0_5 = arith.constant 0 : index
    %c0_6 = arith.constant 0 : index
    %7 = vector.load %arg4[%c0_5, %c0_6] : memref<32x1xf32, #tpu.memory_space<vmem>>, vector<32x1xf32>
    %8 = vector.broadcast %7 : vector<32x1xf32> to vector<32x128xf32>
    %9 = arith.mulf %6, %8 : vector<32x128xf32>
    %cst_7 = arith.constant dense<0.000000e+00> : vector<128xf32>
    %10 = vector.multi_reduction <add>, %9, %cst_7 [0] : vector<32x128xf32> to vector<128xf32>
    %11 = vector.shape_cast %10 : vector<128xf32> to vector<1x128xf32>
    %c0_8 = arith.constant 0 : index
    %c0_9 = arith.constant 0 : index
    %12 = vector.load %arg5[%c0_8, %c0_9] : memref<1x1xf32, #tpu.memory_space<vmem>>, vector<1x1xf32>
    %13 = vector.broadcast %12 : vector<1x1xf32> to vector<1x128xf32>
    %14 = arith.addf %11, %13 : vector<1x128xf32>
    %c0_10 = arith.constant 0 : index
    %c0_11 = arith.constant 0 : index
    %15 = vector.load %arg6[%c0_10, %c0_11] : memref<1x128xf32, #tpu.memory_space<vmem>>, vector<1x128xf32>
    tpu.vector_store %arg6[%c0_10, %c0_11], %14 {strides = array<i32>} : memref<1x128xf32, #tpu.memory_space<vmem>>, vector<1x128xf32>,
    return
  }
  func.func @transform_0(%arg0: i32) -> (i32, i32) {
    %c0_i32 = arith.constant 0 : i32
    %c0_i32_0 = arith.constant 0 : i32
    return %c0_i32, %arg0 : i32, i32
  }
  func.func @transform_1(%arg0: i32) -> (i32, i32) {
    %c0_i32 = arith.constant 0 : i32
    %c0_i32_0 = arith.constant 0 : i32
    %c0_i32_1 = arith.constant 0 : i32
    return %c0_i32, %c0_i32_0 : i32, i32
  }
  func.func @transform_2(%arg0: i32) -> (i32, i32) {
    %c0_i32 = arith.constant 0 : i32
    %c0_i32_0 = arith.constant 0 : i32
    %c0_i32_1 = arith.constant 0 : i32
    return %c0_i32, %c0_i32_0 : i32, i32
  }
  func.func @transform_3(%arg0: i32) -> (i32, i32) {
    %c0_i32 = arith.constant 0 : i32
    %c0_i32_0 = arith.constant 0 : i32
    %c0_i32_1 = arith.constant 0 : i32
    return %c0_i32, %c0_i32_0 : i32, i32
  }
  func.func @transform_4(%arg0: i32) -> (i32, i32) {
    %c0_i32 = arith.constant 0 : i32
    %c0_i32_0 = arith.constant 0 : i32
    %c0_i32_1 = arith.constant 0 : i32
    return %c0_i32, %c0_i32_0 : i32, i32
  }
  func.func @transform_5(%arg0: i32) -> (i32, i32) {
    %c0_i32 = arith.constant 0 : i32
    %c0_i32_0 = arith.constant 0 : i32
    return %c0_i32, %arg0 : i32, i32
  }
}

</mosaic_0001>

<bundles_post_ra>
// kernel: policy_forward.1
= control target key start
LH: loop header
LB: loop body
LE: loop exit
PB: predicated region body
PF: predicated region fallthrough
CT: control target
= control target key end

     0   :  { %vm51_vm0 = vcmask 64512   ;;  %v236_v3 = vmov 0   ;;  %v196_v42 = vlaneseq  ;;  %s316_s0 = inlined_call_operand.vmem [shape: f32[8,128], index: 0, kind: input, shape index: {}]   ;;  %s317_s1 = inlined_call_operand.vmem [shape: f32[32,8], index: 1, kind: input, shape index: {}]   ;;  %s318_s2 = inlined_call_operand.vmem [shape: f32[32,1], index: 2, kind: input, shape index: {}]   ;;  %s319_s4 = inlined_call_operand.<no memory space> [shape: f32[1,1], index: 4, kind: input, shape index: {}]   ;;  %s320_s3 = inlined_call_operand.vmem [shape: f32[32,1], index: 3, kind: input, shape index: {}]   ;;  %s321_s5 = inlined_call_operand.vmem [shape: f32[1,128], index: 5, kind: output, shape index: {}]  }
   0x1   :  { %v26_v0 = vld [vmem:[%s316_s0] sm:$0xff]  ;;  %v24_v2 = vld [vmem:[%s317_s1 + $0x10] sm:$0xff]  ;;  %226 = vset.pattern.permute.xlu0 %v236_v3  ;;  %227 = vset.pattern.permute.xlu1 %v236_v3  ;;  %v10_v4 = vstv %s319_s4  ;;  %v23_v5 = vld [vmem:[%s317_s1 + $0x8] sm:$0xff] }
   0x2   :  { %v22_v1 = vld [vmem:[%s317_s1] sm:$0xff]  ;;  %215 = vmatprep.subr.mxu0 %v26_v0  ;;  %223 = vmatprep.subr.mxu1 %v26_v0  ;;  %v25_v6 = vld [vmem:[%s317_s1 + $0x18] sm:$0xff]  ;;  %11 = vst [vmem:[#allocation2] sm:$0x1] %v10_v4  ;;  %v29_v8 = vld [vmem:[%s318_s2 + $0x10] sm:$0xff]  ;;  %v197_v45 = vshrl.u32 %v196_v42, 7 }
   0x3   :  { %216 = vmatpush3.msra.mxu0 %v26_v0  ;;  %224 = vmatpush3.msra.mxu1 %v26_v0  ;;  %v27_v7 = vld [vmem:[%s318_s2] sm:$0xff]  ;;  %v28_v9 = vld [vmem:[%s318_s2 + $0x8] sm:$0xff]  ;;  %v30_v10 = vld [vmem:[%s318_s2 + $0x18] sm:$0xff] }
   0x4   :  { %217 = vmatprep.mubr.msk.f32.mxu0 %vm51_vm0, %v22_v1  ;;  %220 = vmatprep.mubr.msk.f32.mxu1 %vm51_vm0, %v24_v2  ;;  %v153_v11 = vld [vmem:[%s320_s3] sm:$0xff]  ;;  %v154_v12 = vld [vmem:[%s320_s3 + $0x8] sm:$0xff]  ;;  %v155_v13 = vld [vmem:[%s320_s3 + $0x10] sm:$0xff]  ;;  %v198_v48 = vsub.s32 0, %v197_v45 }
   0x5   :  { %218 = vmatmul.mubr.msk.f32.vlgmr.msra.gmra.mrb[0].mxu0 %vm51_vm0, %v23_v5  ;;  %221 = vmatmul.mubr.msk.f32.vlgmr.msra.gmra.mrb[0].mxu1 %vm51_vm0, %v25_v6  ;;  %v156_v14 = vld [vmem:[%s320_s3 + $0x18] sm:$0xff] }
   0x6   :  { %33 = vperm.xlu0 %226, %v27_v7   ;;  %43 = vperm.xlu1 %227, %v29_v8  }
   0x9   :  { %v190_v15 = vld [vmem:[#allocation2] sm:$0x1] }
   0xa   :  { %38 = vperm.xlu0 %226, %v28_v9   ;;  %48 = vperm.xlu1 %227, %v30_v10  }
   0xe   :  { %159 = vperm.xlu0 %226, %v153_v11   ;;  %164 = vperm.xlu1 %227, %v154_v12  }
  0x12   :  { %169 = vperm.xlu0 %226, %v155_v13   ;;  %174 = vperm.xlu1 %227, %v156_v14  }
  0x16   :  { %193 = vperm.xlu0 %226, %v190_v15  }
  0x85   :  { %v34_v16 = vpop.permute.xlu0 %33  ;;  %v44_v17 = vpop.permute.xlu1 %43 }
  0x89   :  { %v39_v18 = vpop.permute.xlu0 %38  ;;  %v49_v24 = vpop.permute.xlu1 %48 }
  0x8d   :  { %v160_v28 = vpop.permute.xlu0 %159  ;;  %v165_v30 = vpop.permute.xlu1 %164 }
  0x91   :  { %v170_v36 = vpop.permute.xlu0 %169  ;;  %v175_v39 = vpop.permute.xlu1 %174 }
  0x95   :  { %v194_v50 = vpop.permute.xlu0 %193 }
  0x96   :  { %v199_v52 = vrot.slane %v194_v50, %v198_v48 }
  0xd8   :  { %v219_v19 = vpop.f32.mrb[0].mxu0  ;;  %v222_v20 = vpop.f32.mrb[0].mxu1 }
  0xd9   :  { %v136_v21 = vadd.f32 %v219_v19, %v39_v18  ;;  %v130_v22 = vpop.f32.mrb[1].mxu0  ;;  %v140_v23 = vpop.f32.mrb[1].mxu1  ;;  %v146_v27 = vadd.f32 %v222_v20, %v49_v24 }
  0xda   :  { %v131_v25 = vadd.f32 %v130_v22, %v34_v16  ;;  %v141_v26 = vadd.f32 %v140_v23, %v44_v17 }
  0xdb   :  { %228 = vtanh.f32 %v136_v21 }
  0xdc   :  { %230 = vtanh.f32 %v131_v25 }
  0xdd   :  { %232 = vtanh.f32 %v141_v26 }
  0xde   :  { %234 = vtanh.f32 %v146_v27 }
  0xe5   :  { %v229_v29 = vpop.eup %228 }
  0xe6   :  { %v178_v31 = vmul.f32 %v229_v29, %v165_v30  ;;  %v231_v32 = vpop.eup %230 }
  0xe7   :  { %v233_v33 = vpop.eup %232  ;;  %v177_v34 = vmul.f32 %v231_v32, %v160_v28 }
  0xe8   :  { %v235_v35 = vpop.eup %234  ;;  %v179_v38 = vmul.f32 %v233_v33, %v170_v36 }
  0xe9   :  { %v181_v37 = vadd.f32 %v178_v31, %v177_v34  ;;  %v180_v40 = vmul.f32 %v235_v35, %v175_v39 }
  0xeb   :  { %v182_v41 = vadd.f32 %v181_v37, %v179_v38 }
  0xed   :  { %v183_v43 = vadd.f32 %v182_v41, %v180_v40 }
  0xef   :  { %v184_v44 = vrot.slane %v183_v43, 4 }
  0xf1   :  { %v185_v46 = vadd.f32 %v184_v44, %v183_v43 }
  0xf3   :  { %v186_v47 = vrot.slane %v185_v46, 2 }
  0xf5   :  { %v187_v49 = vadd.f32 %v186_v47, %v185_v46 }
  0xf7   :  { %v188_v51 = vrot.slane %v187_v49, 1 }
  0xf9   :  { %v189_v53 = vadd.f32 %v188_v51, %v187_v49 }
  0xfb   :  { %v200_v54 = vadd.f32 %v199_v52, %v189_v53 }
  0xfd   :  { %201 = vst [vmem:[%s321_s5] sm:$0x1] %v200_v54 }

</bundles_post_ra>
